<compile_context>
chip_gen: v6e
topology: v6e:2x2x1
jax: 0.10.0
libtpu: 0.0.40
codegen_flags: <defaults>
</compile_context>

<pallas_src>
import functools

import jax
import jax.numpy as jnp
from jax.experimental import pallas as pl
from jax.experimental.pallas import tpu as pltpu

IN_FEATURES = 784        # 1 * 28 * 28
K_PAD = 896              # 7 * 128 (lane-aligned contraction dim)
HIDDEN = 512
NUM_CLASSES = 10
N_PAD = 128              # lane-dense output width


def _round_up(x, m):
    return ((x + m - 1) // m) * m


def _mlp_kernel(x_ref, w1_ref, b1_ref, w2_ref, b2_ref, o_ref):
    """Fused: linear1 -> ReLU -> linear2 (bias row already carries alpha*reg)."""
    # linear1: (TB, 896)bf16 @ (896, 512)bf16 -> f32 acc, + b1 (f32), ReLU (VPU f32)
    h = jnp.dot(x_ref[...], w1_ref[...], preferred_element_type=jnp.float32)
    h = jnp.maximum(h + b1_ref[...], 0.0)
    # linear2: (TB, 512)bf16 @ (512, 128)bf16 -> f32 acc, + (b2 + alpha*reg)
    y = jnp.dot(h.astype(jnp.bfloat16), w2_ref[...],
                preferred_element_type=jnp.float32)
    o_ref[...] = y + b2_ref[...]


@functools.partial(jax.jit, static_argnames=("regularization", "alpha"))
def vanilla_net_mnist_forward(x, w1, b1, w2, b2, regularization="none", alpha=0.0):
    """x: (B, 1, 28, 28) or (B, 784) float32. Returns (B, 10) float32 logits."""
    B = x.shape[0]
    x_flat = x.reshape(B, -1).astype(jnp.float32)  # torch.nn.Flatten()

    # Regularization term (glue: tiny scalar reductions over params, done in JAX).
    # Matches torch: L1 = sum_p ||p||_1 ; L2 = sum_p ||p||_2 (per-tensor norm).
    if regularization == "l1":
        reg = sum(jnp.sum(jnp.abs(p.astype(jnp.float32))) for p in (w1, b1, w2, b2))
    elif regularization == "l2":
        reg = sum(jnp.sqrt(jnp.sum(p.astype(jnp.float32) ** 2)) for p in (w1, b1, w2, b2))
    else:
        reg = jnp.float32(0.0)
    reg_term = jnp.float32(alpha) * reg.astype(jnp.float32)

    # Batch tile: 256-aligned for big batches (fills the MXU M dim), otherwise
    # the smallest 8-aligned tile covering B (keeps VMEM tiny and avoids
    # wasting MXU cycles on padding at toy batch sizes).
    TB = min(256, _round_up(B, 8))
    B_pad = _round_up(B, TB)
    grid = (B_pad // TB,)

    # --- prepare lane-aligned, bf16 MXU operands -----------------------------
    # x: pad batch to B_pad, features 784 -> 896 with zeros; cast to bf16.
    x_p = jnp.pad(x_flat, ((0, B_pad - B), (0, K_PAD - IN_FEATURES)))
    x_p = x_p.astype(jnp.bfloat16)
    # W1: (784, 512) -> (896, 512), zero rows for the padded K; bf16.
    w1_p = jnp.pad(w1.astype(jnp.bfloat16), ((0, K_PAD - IN_FEATURES), (0, 0)))
    b1_row = b1.reshape(1, HIDDEN).astype(jnp.float32)
    # W2: (512, 10) -> (512, 128), zero columns; bf16.
    w2_p = jnp.pad(w2.astype(jnp.bfloat16), ((0, 0), (0, N_PAD - NUM_CLASSES)))
    # b2 padded to (1, 128) with alpha*reg folded in (extra lanes sliced off later).
    b2_row = jnp.pad(b2.reshape(1, NUM_CLASSES).astype(jnp.float32),
                     ((0, 0), (0, N_PAD - NUM_CLASSES))) + reg_term

    out = pl.pallas_call(
        _mlp_kernel,
        out_shape=jax.ShapeDtypeStruct((B_pad, N_PAD), jnp.float32),
        grid_spec=pltpu.PrefetchScalarGridSpec(
            num_scalar_prefetch=0,
            grid=grid,
            in_specs=[
                pl.BlockSpec((TB, K_PAD), lambda i: (i, 0)),       # x tile
                pl.BlockSpec((K_PAD, HIDDEN), lambda i: (0, 0)),   # W1 (resident)
                pl.BlockSpec((1, HIDDEN), lambda i: (0, 0)),       # b1 (resident)
                pl.BlockSpec((HIDDEN, N_PAD), lambda i: (0, 0)),   # W2 (resident)
                pl.BlockSpec((1, N_PAD), lambda i: (0, 0)),        # b2 (+alpha*reg)
            ],
            out_specs=pl.BlockSpec((TB, N_PAD), lambda i: (i, 0)),
        ),
        compiler_params=pltpu.CompilerParams(
            dimension_semantics=("parallel",),
        ),
    )(x_p, w1_p, b1_row, w2_p, b2_row)

    return out[:B, :NUM_CLASSES]


def init_params(key):
    """Deterministic init mimicking torch.nn.Linear default U(-1/sqrt(fan_in), ...).
    Weights are stored pre-transposed as (in_features, out_features)."""
    k1, k2, k3, k4 = jax.random.split(key, 4)
    bound1 = 1.0 / jnp.sqrt(IN_FEATURES)
    bound2 = 1.0 / jnp.sqrt(HIDDEN)
    w1 = jax.random.uniform(k1, (IN_FEATURES, HIDDEN), jnp.float32, -bound1, bound1)
    b1 = jax.random.uniform(k2, (HIDDEN,), jnp.float32, -bound1, bound1)
    w2 = jax.random.uniform(k3, (HIDDEN, NUM_CLASSES), jnp.float32, -bound2, bound2)
    b2 = jax.random.uniform(k4, (NUM_CLASSES,), jnp.float32, -bound2, bound2)
    return w1, b1, w2, b2


def reference_forward(x, w1, b1, w2, b2, alpha=0.0, reg=0.0):
    """Pure-JAX reference using the same bf16-operand / f32-accumulate recipe."""
    x_flat = x.reshape(x.shape[0], -1).astype(jnp.float32)
    h = jnp.dot(x_flat.astype(jnp.bfloat16), w1.astype(jnp.bfloat16),
                preferred_element_type=jnp.float32) + b1
    h = jnp.maximum(h, 0.0)
    y = jnp.dot(h.astype(jnp.bfloat16), w2.astype(jnp.bfloat16),
                preferred_element_type=jnp.float32) + b2
    return y + alpha * reg


if __name__ == "__main__":
    key = jax.random.PRNGKey(0)
    kx, kp = jax.random.split(key)

    # MNIST-shaped NCHW input at a small batch.
    B = 8
    x = jax.random.uniform(kx, (B, 1, 28, 28), jnp.float32)
    w1, b1, w2, b2 = init_params(kp)

    # Default module config: RegularizationMethod.NONE, alpha=0.0
    y = vanilla_net_mnist_forward(x, w1, b1, w2, b2, regularization="none", alpha=0.0)
    y = jax.block_until_ready(y)

    y_ref = reference_forward(x, w1, b1, w2, b2)
    assert y.shape == (B, NUM_CLASSES)
    assert jnp.allclose(y, y_ref, atol=1e-2, rtol=1e-2), "mismatch vs JAX reference"

    # Also exercise the L2-regularized path (alpha*reg folded into the bias row).
    reg_l2 = sum(jnp.sqrt(jnp.sum(p * p)) for p in (w1, b1, w2, b2))
    y2 = vanilla_net_mnist_forward(x, w1, b1, w2, b2, regularization="l2", alpha=0.01)
    y2 = jax.block_until_ready(y2)
    y2_ref = reference_forward(x, w1, b1, w2, b2, alpha=0.01, reg=reg_l2)
    assert jnp.allclose(y2, y2_ref, atol=1e-2, rtol=1e-2), "mismatch (l2 reg) vs reference"

    print("KERNEL_OK")
</pallas_src>

<mosaic_0001>
module attributes {stable_mosaic.version = 11 : i64} {
  func.func @_mlp_kernel(%arg0: i32, %arg1: memref<8x896xbf16, #tpu.memory_space<vmem>>, %arg2: memref<896x512xbf16, #tpu.memory_space<vmem>>, %arg3: memref<1x512xf32, #tpu.memory_space<vmem>>, %arg4: memref<512x128xbf16, #tpu.memory_space<vmem>>, %arg5: memref<1x128xf32, #tpu.memory_space<vmem>>, %arg6: memref<8x128xf32, #tpu.memory_space<vmem>>) attributes {dimension_semantics = [#tpu.dimension_semantics<parallel>], iteration_bounds = array<i64: 1>, scalar_prefetch = 0 : i64, scratch_operands = 0 : i64, tpu.core_type = #tpu.core_type<tc>, window_params = [{transform_indices = @transform_0, window_bounds = array<i64: 8, 896>}, {pipeline_mode = #tpu.pipeline_mode<synchronous>, transform_indices = @transform_1, window_bounds = array<i64: 896, 512>}, {pipeline_mode = #tpu.pipeline_mode<synchronous>, transform_indices = @transform_2, window_bounds = array<i64: 1, 512>}, {pipeline_mode = #tpu.pipeline_mode<synchronous>, transform_indices = @transform_3, window_bounds = array<i64: 512, 128>}, {pipeline_mode = #tpu.pipeline_mode<synchronous>, transform_indices = @transform_4, window_bounds = array<i64: 1, 128>}, {transform_indices = @transform_5, window_bounds = array<i64: 8, 128>}]} {
    %c0 = arith.constant 0 : index
    %c0_0 = arith.constant 0 : index
    %0 = vector.load %arg1[%c0, %c0_0] : memref<8x896xbf16, #tpu.memory_space<vmem>>, vector<8x896xbf16>
    %c0_1 = arith.constant 0 : index
    %c0_2 = arith.constant 0 : index
    %1 = vector.load %arg2[%c0_1, %c0_2] : memref<896x512xbf16, #tpu.memory_space<vmem>>, vector<896x512xbf16>
    %cst = arith.constant dense<0.000000e+00> : vector<8x512xf32>
    %2 = tpu.matmul %0, %1, %cst {dimension_numbers = #tpu.dot_dimension_numbers<[1], [0], [0], [1], [0, 0, 1, 1], [], []>} : vector<8x896xbf16>, vector<896x512xbf16>, vector<8x512xf32> -> vector<8x512xf32>
    %c0_3 = arith.constant 0 : index
    %c0_4 = arith.constant 0 : index
    %3 = vector.load %arg3[%c0_3, %c0_4] : memref<1x512xf32, #tpu.memory_space<vmem>>, vector<1x512xf32>
    %4 = vector.broadcast %3 : vector<1x512xf32> to vector<8x512xf32>
    %5 = arith.addf %2, %4 : vector<8x512xf32>
    %cst_5 = arith.constant 0.000000e+00 : f32
    %6 = vector.broadcast %cst_5 : f32 to vector<8x512xf32>
    %7 = arith.maximumf %5, %6 : vector<8x512xf32>
    %8 = arith.truncf %7 : vector<8x512xf32> to vector<8x512xbf16>
    %c0_6 = arith.constant 0 : index
    %c0_7 = arith.constant 0 : index
    %9 = vector.load %arg4[%c0_6, %c0_7] : memref<512x128xbf16, #tpu.memory_space<vmem>>, vector<512x128xbf16>
    %cst_8 = arith.constant dense<0.000000e+00> : vector<8x128xf32>
    %10 = tpu.matmul %8, %9, %cst_8 {dimension_numbers = #tpu.dot_dimension_numbers<[1], [0], [0], [1], [0, 0, 1, 1], [], []>} : vector<8x512xbf16>, vector<512x128xbf16>, vector<8x128xf32> -> vector<8x128xf32>
    %c0_9 = arith.constant 0 : index
    %c0_10 = arith.constant 0 : index
    %11 = vector.load %arg5[%c0_9, %c0_10] : memref<1x128xf32, #tpu.memory_space<vmem>>, vector<1x128xf32>
    %12 = vector.broadcast %11 : vector<1x128xf32> to vector<8x128xf32>
    %13 = arith.addf %10, %12 : vector<8x128xf32>
    %c0_11 = arith.constant 0 : index
    %c0_12 = arith.constant 0 : index
    %14 = vector.load %arg6[%c0_11, %c0_12] : memref<8x128xf32, #tpu.memory_space<vmem>>, vector<8x128xf32>
    tpu.vector_store %arg6[%c0_11, %c0_12], %13 {strides = array<i32>} : memref<8x128xf32, #tpu.memory_space<vmem>>, vector<8x128xf32>,
    return
  }
  func.func @transform_0(%arg0: i32) -> (i32, i32) {
    %c0_i32 = arith.constant 0 : i32
    %c0_i32_0 = arith.constant 0 : i32
    return %arg0, %c0_i32 : i32, i32
  }
  func.func @transform_1(%arg0: i32) -> (i32, i32) {
    %c0_i32 = arith.constant 0 : i32
    %c0_i32_0 = arith.constant 0 : i32
    %c0_i32_1 = arith.constant 0 : i32
    return %c0_i32, %c0_i32_0 : i32, i32
  }
  func.func @transform_2(%arg0: i32) -> (i32, i32) {
    %c0_i32 = arith.constant 0 : i32
    %c0_i32_0 = arith.constant 0 : i32
    %c0_i32_1 = arith.constant 0 : i32
    return %c0_i32, %c0_i32_0 : i32, i32
  }
  func.func @transform_3(%arg0: i32) -> (i32, i32) {
    %c0_i32 = arith.constant 0 : i32
    %c0_i32_0 = arith.constant 0 : i32
    %c0_i32_1 = arith.constant 0 : i32
    return %c0_i32, %c0_i32_0 : i32, i32
  }
  func.func @transform_4(%arg0: i32) -> (i32, i32) {
    %c0_i32 = arith.constant 0 : i32
    %c0_i32_0 = arith.constant 0 : i32
    %c0_i32_1 = arith.constant 0 : i32
    return %c0_i32, %c0_i32_0 : i32, i32
  }
  func.func @transform_5(%arg0: i32) -> (i32, i32) {
    %c0_i32 = arith.constant 0 : i32
    %c0_i32_0 = arith.constant 0 : i32
    return %arg0, %c0_i32 : i32, i32
  }
}

</mosaic_0001>

<bundles_post_ra>
// kernel: vanilla_net_mnist_forward.1
= control target key start
LH: loop header
LB: loop body
LE: loop exit
PB: predicated region body
PF: predicated region fallthrough
CT: control target
= control target key end

     0   :  { %s3675_s0 = inlined_call_operand.vmem [shape: bf16[8,896], index: 0, kind: input, shape index: {}]   ;;  %s3676_s1 = inlined_call_operand.vmem [shape: bf16[896,512], index: 1, kind: input, shape index: {}]   ;;  %s3677_s2 = inlined_call_operand.vmem [shape: f32[1,512], index: 2, kind: input, shape index: {}]   ;;  %s3678_s3 = inlined_call_operand.vmem [shape: bf16[512,128], index: 3, kind: input, shape index: {}]   ;;  %s3679_s4 = inlined_call_operand.vmem [shape: f32[1,128], index: 4, kind: input, shape index: {}]   ;;  %s3680_s5 = inlined_call_operand.hbm [shape: f32[8,128], index: 5, kind: output, shape index: {}]  }
   0x1   :  { %v2421_v0 = vld [vmem:[%s3676_s1 + $0xe4] ss:$16 sps:$4 sm:$0xff]   ;;  %v2425_v2 = vld [vmem:[%s3676_s1 + $0xe0] ss:$16 sps:$4 sm:$0xff]   ;;  %v23_v48 = vld [vmem:[%s3675_s0 + $0x8] sm:$0xff] }
   0x2   :  { %v2423_v1 = vld [vmem:[%s3676_s1 + $0x2e4] ss:$16 sps:$4 sm:$0xff]   ;;  %1417 = vmatprep.subr.bf16.mxu0 %v2421_v0  ;;  %v2426_v3 = vld [vmem:[%s3676_s1 + $0x2e0] ss:$16 sps:$4 sm:$0xff]   ;;  %v3002_v51 = vcombine.high %v23_v48, %v23_v48 }
   0x3   :  { %1458 = vmatprep.subr.bf16.mxu1 %v2423_v1  ;;  %v2427_v4 = vld [vmem:[%s3676_s1 + $0xc4] ss:$16 sps:$4 sm:$0xff]   ;;  %1418 = vmatpush1.bf16.msra.mxu0 %v2425_v2  ;;  %v2431_v6 = vld [vmem:[%s3676_s1 + $0xc0] ss:$16 sps:$4 sm:$0xff]  }
   0x4   :  { %1459 = vmatpush1.bf16.msra.mxu1 %v2426_v3  ;;  %v2429_v5 = vld [vmem:[%s3676_s1 + $0x2c4] ss:$16 sps:$4 sm:$0xff]   ;;  %1419 = vmatprep.subr.bf16.mxu0 %v2427_v4  ;;  %v2432_v7 = vld [vmem:[%s3676_s1 + $0x2c0] ss:$16 sps:$4 sm:$0xff]  }
   0x5   :  { %1460 = vmatprep.subr.bf16.mxu1 %v2429_v5  ;;  %v2433_v8 = vld [vmem:[%s3676_s1 + $0xa4] ss:$16 sps:$4 sm:$0xff]   ;;  %v2437_v10 = vld [vmem:[%s3676_s1 + $0xa0] ss:$16 sps:$4 sm:$0xff]   ;;  %1490 = vmatprep.mubr.bf16.mxu1 %v3002_v51 }
   0x6   :  { %v2435_v9 = vld [vmem:[%s3676_s1 + $0x2a4] ss:$16 sps:$4 sm:$0xff]   ;;  %v2438_v11 = vld [vmem:[%s3676_s1 + $0x2a0] ss:$16 sps:$4 sm:$0xff]  }
   0x7   :  { %1420 = vmatpush1.bf16.msra.mxu0 %v2431_v6  ;;  %v2439_v12 = vld [vmem:[%s3676_s1 + $0x84] ss:$16 sps:$4 sm:$0xff]   ;;  %v2443_v14 = vld [vmem:[%s3676_s1 + $0x80] ss:$16 sps:$4 sm:$0xff]  }
   0x8   :  { %1461 = vmatpush1.bf16.msra.mxu1 %v2432_v7  ;;  %1421 = vmatprep.subr.bf16.mxu0 %v2433_v8  ;;  %v2441_v13 = vld [vmem:[%s3676_s1 + $0x284] ss:$16 sps:$4 sm:$0xff]   ;;  %v2444_v15 = vld [vmem:[%s3676_s1 + $0x280] ss:$16 sps:$4 sm:$0xff]   ;;  %v3062_v7 = vcombine.low %v23_v48, %v23_v48  ;;  %v2581_v48 = vld [vmem:[%s3676_s1 + $0xcc] ss:$16 sps:$4 sm:$0xff]  }
   0x9   :  { %1462 = vmatprep.subr.bf16.mxu1 %v2435_v9  ;;  %v2445_v16 = vld [vmem:[%s3676_s1 + $0x64] ss:$16 sps:$4 sm:$0xff]   ;;  %v2449_v18 = vld [vmem:[%s3676_s1 + $0x60] ss:$16 sps:$4 sm:$0xff]  }
   0xa   :  { %v2447_v17 = vld [vmem:[%s3676_s1 + $0x264] ss:$16 sps:$4 sm:$0xff]   ;;  %v2450_v19 = vld [vmem:[%s3676_s1 + $0x260] ss:$16 sps:$4 sm:$0xff]  }
   0xb   :  { %1422 = vmatpush1.bf16.msra.mxu0 %v2437_v10  ;;  %v2451_v20 = vld [vmem:[%s3676_s1 + $0x44] ss:$16 sps:$4 sm:$0xff]   ;;  %v2455_v22 = vld [vmem:[%s3676_s1 + $0x40] ss:$16 sps:$4 sm:$0xff]  }
   0xc   :  { %1463 = vmatpush1.bf16.msra.mxu1 %v2438_v11  ;;  %1423 = vmatprep.subr.bf16.mxu0 %v2439_v12  ;;  %v2453_v21 = vld [vmem:[%s3676_s1 + $0x244] ss:$16 sps:$4 sm:$0xff]   ;;  %v2456_v23 = vld [vmem:[%s3676_s1 + $0x240] ss:$16 sps:$4 sm:$0xff]  }
   0xd   :  { %1464 = vmatprep.subr.bf16.mxu1 %v2441_v13  ;;  %v2457_v24 = vld [vmem:[%s3676_s1 + $0x24] ss:$16 sps:$4 sm:$0xff]   ;;  %v2461_v26 = vld [vmem:[%s3676_s1 + $0x20] ss:$16 sps:$4 sm:$0xff]  }
   0xe   :  { %v2459_v25 = vld [vmem:[%s3676_s1 + $0x224] ss:$16 sps:$4 sm:$0xff]   ;;  %v2462_v27 = vld [vmem:[%s3676_s1 + $0x220] ss:$16 sps:$4 sm:$0xff]  }
   0xf   :  { %1424 = vmatpush1.bf16.msra.mxu0 %v2443_v14  ;;  %v2463_v28 = vld [vmem:[%s3676_s1 + $0x4] ss:$16 sps:$4 sm:$0xff]   ;;  %v2467_v30 = vld [vmem:[%s3676_s1] ss:$16 sps:$4 sm:$0xff]  }
  0x10   :  { %1465 = vmatpush1.bf16.msra.mxu1 %v2444_v15  ;;  %1425 = vmatprep.subr.bf16.mxu0 %v2445_v16  ;;  %v2465_v29 = vld [vmem:[%s3676_s1 + $0x204] ss:$16 sps:$4 sm:$0xff]   ;;  %v2468_v31 = vld [vmem:[%s3676_s1 + $0x200] ss:$16 sps:$4 sm:$0xff]   ;;  %v2818_v16 = vmov 0  }
  0x11   :  { %1466 = vmatprep.subr.bf16.mxu1 %v2447_v17  ;;  %v2469_v32 = vld [vmem:[%s3676_s1 + $0x1e4] ss:$16 sps:$4 sm:$0xff]   ;;  %v2473_v34 = vld [vmem:[%s3676_s1 + $0x1e0] ss:$16 sps:$4 sm:$0xff]  }
  0x12   :  { %v2471_v33 = vld [vmem:[%s3676_s1 + $0x3e4] ss:$16 sps:$4 sm:$0xff]   ;;  %v2474_v35 = vld [vmem:[%s3676_s1 + $0x3e0] ss:$16 sps:$4 sm:$0xff]  }
  0x13   :  { %1426 = vmatpush1.bf16.msra.mxu0 %v2449_v18  ;;  %v2475_v36 = vld [vmem:[%s3676_s1 + $0x1c4] ss:$16 sps:$4 sm:$0xff]   ;;  %v2479_v38 = vld [vmem:[%s3676_s1 + $0x1c0] ss:$16 sps:$4 sm:$0xff]  }
  0x14   :  { %1467 = vmatpush1.bf16.msra.mxu1 %v2450_v19  ;;  %1427 = vmatprep.subr.bf16.mxu0 %v2451_v20  ;;  %v2477_v37 = vld [vmem:[%s3676_s1 + $0x3c4] ss:$16 sps:$4 sm:$0xff]   ;;  %v2480_v39 = vld [vmem:[%s3676_s1 + $0x3c0] ss:$16 sps:$4 sm:$0xff]  }
  0x15   :  { %1468 = vmatprep.subr.bf16.mxu1 %v2453_v21  ;;  %v2481_v40 = vld [vmem:[%s3676_s1 + $0x1a4] ss:$16 sps:$4 sm:$0xff]   ;;  %v2485_v42 = vld [vmem:[%s3676_s1 + $0x1a0] ss:$16 sps:$4 sm:$0xff]  }
  0x16   :  { %v2483_v41 = vld [vmem:[%s3676_s1 + $0x3a4] ss:$16 sps:$4 sm:$0xff]   ;;  %v2486_v43 = vld [vmem:[%s3676_s1 + $0x3a0] ss:$16 sps:$4 sm:$0xff]  }
  0x17   :  { %1428 = vmatpush1.bf16.msra.mxu0 %v2455_v22  ;;  %v2487_v44 = vld [vmem:[%s3676_s1 + $0x184] ss:$16 sps:$4 sm:$0xff]   ;;  %v2491_v49 = vld [vmem:[%s3676_s1 + $0x180] ss:$16 sps:$4 sm:$0xff]  }
  0x18   :  { %1469 = vmatpush1.bf16.msra.mxu1 %v2456_v23  ;;  %1429 = vmatprep.subr.bf16.mxu0 %v2457_v24  ;;  %v2489_v45 = vld [vmem:[%s3676_s1 + $0x384] ss:$16 sps:$4 sm:$0xff]   ;;  %v2492_v50 = vld [vmem:[%s3676_s1 + $0x380] ss:$16 sps:$4 sm:$0xff]  }
  0x19   :  { %1470 = vmatprep.subr.bf16.mxu1 %v2459_v25  ;;  %v22_v46 = vld [vmem:[%s3675_s0] sm:$0xff] }
  0x1a   :  { %v2991_v47 = vcombine.high %v22_v46, %v22_v46  ;;  %v2493_v52 = vld [vmem:[%s3676_s1 + $0x164] ss:$16 sps:$4 sm:$0xff]   ;;  %v2497_v54 = vld [vmem:[%s3676_s1 + $0x160] ss:$16 sps:$4 sm:$0xff]   ;;  %v3060_v6 = vcombine.low %v22_v46, %v22_v46 }
  0x1b   :  { %1430 = vmatpush1.bf16.msra.mxu0 %v2461_v26  ;;  %v2495_v53 = vld [vmem:[%s3676_s1 + $0x364] ss:$16 sps:$4 sm:$0xff]   ;;  %v2498_v55 = vld [vmem:[%s3676_s1 + $0x360] ss:$16 sps:$4 sm:$0xff]  }
  0x1c   :  { %1471 = vmatpush1.bf16.msra.mxu1 %v2462_v27  ;;  %1431 = vmatprep.subr.bf16.mxu0 %v2463_v28  ;;  %v2499_v56 = vld [vmem:[%s3676_s1 + $0x144] ss:$16 sps:$4 sm:$0xff]   ;;  %v2503_v58 = vld [vmem:[%s3676_s1 + $0x140] ss:$16 sps:$4 sm:$0xff]  }
  0x1d   :  { %1472 = vmatprep.subr.bf16.mxu1 %v2465_v29  ;;  %1449 = vmatprep.mubr.bf16.mxu0 %v2991_v47  ;;  %v2501_v57 = vld [vmem:[%s3676_s1 + $0x344] ss:$16 sps:$4 sm:$0xff]   ;;  %v2504_v59 = vld [vmem:[%s3676_s1 + $0x340] ss:$16 sps:$4 sm:$0xff]  }
  0x1e   :  { %v2505_v60 = vld [vmem:[%s3676_s1 + $0x124] ss:$16 sps:$4 sm:$0xff]   ;;  %v2509_v62 = vld [vmem:[%s3676_s1 + $0x120] ss:$16 sps:$4 sm:$0xff]  }
  0x1f   :  { %1432 = vmatpush1.bf16.msra.mxu0 %v2467_v30  ;;  %v2507_v61 = vld [vmem:[%s3676_s1 + $0x324] ss:$16 sps:$4 sm:$0xff]   ;;  %v2510_v63 = vld [vmem:[%s3676_s1 + $0x320] ss:$16 sps:$4 sm:$0xff]  }
  0x20   :  { %1473 = vmatpush1.bf16.msra.mxu1 %v2468_v31  ;;  %1433 = vmatprep.subr.bf16.mxu0 %v2469_v32  ;;  %v2511_v0 = vld [vmem:[%s3676_s1 + $0x104] ss:$16 sps:$4 sm:$0xff]   ;;  %v2515_v2 = vld [vmem:[%s3676_s1 + $0x100] ss:$16 sps:$4 sm:$0xff]  }
  0x21   :  { %1474 = vmatprep.subr.bf16.mxu1 %v2471_v33  ;;  %v2513_v1 = vld [vmem:[%s3676_s1 + $0x304] ss:$16 sps:$4 sm:$0xff]   ;;  %v2516_v3 = vld [vmem:[%s3676_s1 + $0x300] ss:$16 sps:$4 sm:$0xff]  }
  0x22   :  { %v2523_v4 = vld [vmem:[%s3676_s1 + $0x4e4] ss:$16 sps:$4 sm:$0xff]   ;;  %v2521_v8 = vld [vmem:[%s3676_s1 + $0x4e0] ss:$16 sps:$4 sm:$0xff]  }
  0x23   :  { %1434 = vmatpush2.bf16.msra.mxu0 %v2473_v34  ;;  %v2526_v5 = vld [vmem:[%s3676_s1 + $0x6e4] ss:$16 sps:$4 sm:$0xff]   ;;  %v2524_v9 = vld [vmem:[%s3676_s1 + $0x6e0] ss:$16 sps:$4 sm:$0xff]  }
  0x24   :  { %1475 = vmatpush2.bf16.msra.mxu1 %v2474_v35  ;;  %1435 = vmatprep.subr.bf16.mxu0 %v2475_v36  ;;  %v2529_v10 = vld [vmem:[%s3676_s1 + $0x4c4] ss:$16 sps:$4 sm:$0xff]   ;;  %v2527_v12 = vld [vmem:[%s3676_s1 + $0x4c0] ss:$16 sps:$4 sm:$0xff]  }
  0x25   :  { %1476 = vmatprep.subr.bf16.mxu1 %v2477_v37  ;;  %v2532_v11 = vld [vmem:[%s3676_s1 + $0x6c4] ss:$16 sps:$4 sm:$0xff]   ;;  %v2530_v13 = vld [vmem:[%s3676_s1 + $0x6c0] ss:$16 sps:$4 sm:$0xff]  }
  0x26   :  { %v2535_v14 = vld [vmem:[%s3676_s1 + $0x4a4] ss:$16 sps:$4 sm:$0xff]   ;;  %v2533_v17 = vld [vmem:[%s3676_s1 + $0x4a0] ss:$16 sps:$4 sm:$0xff]  }
  0x27   :  { %1436 = vmatpush2.bf16.msra.mxu0 %v2479_v38  ;;  %v2538_v15 = vld [vmem:[%s3676_s1 + $0x6a4] ss:$16 sps:$4 sm:$0xff]   ;;  %v2536_v18 = vld [vmem:[%s3676_s1 + $0x6a0] ss:$16 sps:$4 sm:$0xff]  }
  0x28   :  { %1477 = vmatpush2.bf16.msra.mxu1 %v2480_v39  ;;  %1437 = vmatprep.subr.bf16.mxu0 %v2481_v40  ;;  %v2541_v19 = vld [vmem:[%s3676_s1 + $0x484] ss:$16 sps:$4 sm:$0xff]   ;;  %v2539_v21 = vld [vmem:[%s3676_s1 + $0x480] ss:$16 sps:$4 sm:$0xff]  }
  0x29   :  { %1478 = vmatprep.subr.bf16.mxu1 %v2483_v41  ;;  %v2544_v20 = vld [vmem:[%s3676_s1 + $0x684] ss:$16 sps:$4 sm:$0xff]   ;;  %v2542_v22 = vld [vmem:[%s3676_s1 + $0x680] ss:$16 sps:$4 sm:$0xff]  }
  0x2a   :  { %v2547_v23 = vld [vmem:[%s3676_s1 + $0x464] ss:$16 sps:$4 sm:$0xff]   ;;  %v2545_v25 = vld [vmem:[%s3676_s1 + $0x460] ss:$16 sps:$4 sm:$0xff]  }
  0x2b   :  { %1438 = vmatpush2.bf16.msra.mxu0 %v2485_v42  ;;  %v2550_v24 = vld [vmem:[%s3676_s1 + $0x664] ss:$16 sps:$4 sm:$0xff]   ;;  %v2548_v26 = vld [vmem:[%s3676_s1 + $0x660] ss:$16 sps:$4 sm:$0xff]   ;;  %v2575_v42 = vld [vmem:[%s3676_s1 + $0xec] ss:$16 sps:$4 sm:$0xff]  }
  0x2c   :  { %1479 = vmatpush2.bf16.msra.mxu1 %v2486_v43  ;;  %1439 = vmatprep.subr.bf16.mxu0 %v2487_v44  ;;  %v2553_v27 = vld [vmem:[%s3676_s1 + $0x444] ss:$16 sps:$4 sm:$0xff]   ;;  %v2551_v29 = vld [vmem:[%s3676_s1 + $0x440] ss:$16 sps:$4 sm:$0xff]   ;;  %v3179_v44 = vld [vmem:[%s3675_s0 + $0x18] ss:$0 sps:$4 sm:$0xff]  }
  0x2d   :  { %1480 = vmatprep.subr.bf16.mxu1 %v2489_v45  ;;  %v2556_v28 = vld [vmem:[%s3676_s1 + $0x644] ss:$16 sps:$4 sm:$0xff]   ;;  %v2554_v30 = vld [vmem:[%s3676_s1 + $0x640] ss:$16 sps:$4 sm:$0xff]   ;;  %v2573_v45 = vld [vmem:[%s3676_s1 + $0xe8] ss:$16 sps:$4 sm:$0xff]  }
  0x2e   :  { %v2559_v31 = vld [vmem:[%s3676_s1 + $0x424] ss:$16 sps:$4 sm:$0xff]   ;;  %v2557_v34 = vld [vmem:[%s3676_s1 + $0x420] ss:$16 sps:$4 sm:$0xff]  }
  0x2f   :  { %1440 = vmatpush2.bf16.msra.mxu0 %v2491_v49  ;;  %v2562_v32 = vld [vmem:[%s3676_s1 + $0x624] ss:$16 sps:$4 sm:$0xff]   ;;  %v2560_v36 = vld [vmem:[%s3676_s1 + $0x620] ss:$16 sps:$4 sm:$0xff]  }
  0x30   :  { %1481 = vmatpush2.bf16.msra.mxu1 %v2492_v50  ;;  %1441 = vmatprep.subr.bf16.mxu0 %v2493_v52  ;;  %v3142_v33 = vld [vmem:[%s3675_s0 + $0x10] sm:$0xff]  ;;  %v2579_v50 = vld [vmem:[%s3676_s1 + $0xc8] ss:$16 sps:$4 sm:$0xff]  }
  0x31   :  { %1482 = vmatprep.subr.bf16.mxu1 %v2495_v53  ;;  %v3149_v35 = vcombine.high %v3142_v33, %v3142_v33  ;;  %v2565_v37 = vld [vmem:[%s3676_s1 + $0x404] ss:$16 sps:$4 sm:$0xff]   ;;  %v2563_v39 = vld [vmem:[%s3676_s1 + $0x400] ss:$16 sps:$4 sm:$0xff]   ;;  %v2587_v53 = vld [vmem:[%s3676_s1 + $0xac] ss:$16 sps:$4 sm:$0xff]  }
  0x32   :  { %v2568_v38 = vld [vmem:[%s3676_s1 + $0x604] ss:$16 sps:$4 sm:$0xff]   ;;  %v2566_v40 = vld [vmem:[%s3676_s1 + $0x600] ss:$16 sps:$4 sm:$0xff]  }
  0x33   :  { %1442 = vmatpush2.bf16.msra.mxu0 %v2497_v54  ;;  %v2571_v41 = vld [vmem:[%s3676_s1 + $0x5e4] ss:$16 sps:$4 sm:$0xff]   ;;  %v2569_v43 = vld [vmem:[%s3676_s1 + $0x5e0] ss:$16 sps:$4 sm:$0xff]  }
  0x34   :  { %1483 = vmatpush2.bf16.msra.mxu1 %v2498_v55  ;;  %1443 = vmatprep.subr.bf16.mxu0 %v2499_v56  ;;  %v2578_v46 = vld [vmem:[%s3676_s1 + $0x5c4] ss:$16 sps:$4 sm:$0xff]   ;;  %v2576_v49 = vld [vmem:[%s3676_s1 + $0x5c0] ss:$16 sps:$4 sm:$0xff]   ;;  %v2585_v55 = vld [vmem:[%s3676_s1 + $0xa8] ss:$16 sps:$4 sm:$0xff]  }
  0x35   :  { %1484 = vmatprep.subr.bf16.mxu1 %v2501_v57  ;;  %v2584_v52 = vld [vmem:[%s3676_s1 + $0x5a4] ss:$16 sps:$4 sm:$0xff]   ;;  %v2582_v54 = vld [vmem:[%s3676_s1 + $0x5a0] ss:$16 sps:$4 sm:$0xff]  }
  0x36   :  { %v2590_v56 = vld [vmem:[%s3676_s1 + $0x584] ss:$16 sps:$4 sm:$0xff]   ;;  %v2588_v57 = vld [vmem:[%s3676_s1 + $0x580] ss:$16 sps:$4 sm:$0xff]  }
  0x37   :  { %1444 = vmatpush2.bf16.msra.mxu0 %v2503_v58  ;;  %v2591_v58 = vld [vmem:[%s3676_s1 + $0x88] ss:$16 sps:$4 sm:$0xff]  }
  0x38   :  { %1485 = vmatpush2.bf16.msra.mxu1 %v2504_v59  ;;  %1445 = vmatprep.subr.bf16.mxu0 %v2505_v60  ;;  %v2596_v59 = vld [vmem:[%s3676_s1 + $0x564] ss:$16 sps:$4 sm:$0xff]   ;;  %v2599_v60 = vld [vmem:[%s3676_s1 + $0x6c] ss:$16 sps:$4 sm:$0xff]  }
  0x39   :  { %1486 = vmatprep.subr.bf16.mxu1 %v2507_v61  ;;  %v2594_v61 = vld [vmem:[%s3676_s1 + $0x560] ss:$16 sps:$4 sm:$0xff]  }
  0x3b   :  { %1446 = vmatpush2.bf16.msra.mxu0 %v2509_v62  ;;  %v2597_v62 = vld [vmem:[%s3676_s1 + $0x68] ss:$16 sps:$4 sm:$0xff]  }
  0x3c   :  { %1487 = vmatpush2.bf16.msra.mxu1 %v2510_v63  ;;  %1447 = vmatprep.subr.bf16.mxu0 %v2511_v0  ;;  %v2602_v63 = vld [vmem:[%s3676_s1 + $0x544] ss:$16 sps:$4 sm:$0xff]   ;;  %v2605_v0 = vld [vmem:[%s3676_s1 + $0x4c] ss:$16 sps:$4 sm:$0xff]  }
  0x3d   :  { %1488 = vmatprep.subr.bf16.mxu1 %v2513_v1  ;;  %v2600_v1 = vld [vmem:[%s3676_s1 + $0x540] ss:$16 sps:$4 sm:$0xff]  }
  0x3f   :  { %1448 = vmatpush2.bf16.msra.mxu0 %v2515_v2  ;;  %v2603_v2 = vld [vmem:[%s3676_s1 + $0x48] ss:$16 sps:$4 sm:$0xff]  }
  0x40   :  { %1489 = vmatpush2.bf16.msra.mxu1 %v2516_v3  ;;  %1499 = vmatprep.subr.bf16.mxu0 %v2523_v4  ;;  %v2608_v3 = vld [vmem:[%s3676_s1 + $0x524] ss:$16 sps:$4 sm:$0xff]   ;;  %v2611_v4 = vld [vmem:[%s3676_s1 + $0x2c] ss:$16 sps:$4 sm:$0xff]  }
  0x41   :  { %1540 = vmatprep.subr.bf16.mxu1 %v2526_v5  ;;  %v2606_v5 = vld [vmem:[%s3676_s1 + $0x520] ss:$16 sps:$4 sm:$0xff]  }
  0x42   :  { %1450 = vmatmul.mubr.bf16.vlgmr.msra.gmra.mxu0 %v3060_v6 }
  0x43   :  { %1491 = vmatmul.mubr.bf16.vlgmr.msra.gmra.mxu1 %v3062_v7  ;;  %1500 = vmatpush1.bf16.msra.mxu0 %v2521_v8  ;;  %v2609_v8 = vld [vmem:[%s3676_s1 + $0x28] ss:$16 sps:$4 sm:$0xff]  }
  0x44   :  { %1541 = vmatpush1.bf16.msra.mxu1 %v2524_v9  ;;  %1501 = vmatprep.subr.bf16.mxu0 %v2529_v10  ;;  %v2614_v9 = vld [vmem:[%s3676_s1 + $0x504] ss:$16 sps:$4 sm:$0xff]   ;;  %v2617_v10 = vld [vmem:[%s3676_s1 + $0xc] ss:$16 sps:$4 sm:$0xff]  }
  0x45   :  { %1542 = vmatprep.subr.bf16.mxu1 %v2532_v11  ;;  %1572 = vmatprep.mubr.bf16.mxu1 %v2818_v16  ;;  %v2612_v11 = vld [vmem:[%s3676_s1 + $0x500] ss:$16 sps:$4 sm:$0xff]  }
  0x46   :  { %1531 = vmatprep.mubr.bf16.mxu0 %v3149_v35 }
  0x47   :  { %1502 = vmatpush1.bf16.msra.mxu0 %v2527_v12  ;;  %v2615_v12 = vld [vmem:[%s3676_s1 + $0x8] ss:$16 sps:$4 sm:$0xff]  }
  0x48   :  { %1543 = vmatpush1.bf16.msra.mxu1 %v2530_v13  ;;  %1503 = vmatprep.subr.bf16.mxu0 %v2535_v14  ;;  %v2622_v13 = vld [vmem:[%s3676_s1 + $0x1ec] ss:$16 sps:$4 sm:$0xff]  }
  0x49   :  { %1544 = vmatprep.subr.bf16.mxu1 %v2538_v15  ;;  %v2625_v14 = vld [vmem:[%s3676_s1 + $0x2ec] ss:$16 sps:$4 sm:$0xff]   ;;  %v3278_v15 = vcombine.low %v3142_v33, %v3142_v33  ;;  %v2647_v33 = vld [vmem:[%s3676_s1 + $0x268] ss:$16 sps:$4 sm:$0xff]  }
  0x4b   :  { %1504 = vmatpush1.bf16.msra.mxu0 %v2533_v17  ;;  %v2620_v17 = vld [vmem:[%s3676_s1 + $0x1e8] ss:$16 sps:$4 sm:$0xff]  }
  0x4c   :  { %1545 = vmatpush1.bf16.msra.mxu1 %v2536_v18  ;;  %1505 = vmatprep.subr.bf16.mxu0 %v2541_v19  ;;  %v2623_v18 = vld [vmem:[%s3676_s1 + $0x2e8] ss:$16 sps:$4 sm:$0xff]   ;;  %v2628_v19 = vld [vmem:[%s3676_s1 + $0x1cc] ss:$16 sps:$4 sm:$0xff]  }
  0x4d   :  { %1546 = vmatprep.subr.bf16.mxu1 %v2544_v20  ;;  %v2631_v20 = vld [vmem:[%s3676_s1 + $0x2cc] ss:$16 sps:$4 sm:$0xff]  }
  0x4f   :  { %1506 = vmatpush1.bf16.msra.mxu0 %v2539_v21  ;;  %v2626_v21 = vld [vmem:[%s3676_s1 + $0x1c8] ss:$16 sps:$4 sm:$0xff]  }
  0x50   :  { %1547 = vmatpush1.bf16.msra.mxu1 %v2542_v22  ;;  %1507 = vmatprep.subr.bf16.mxu0 %v2547_v23  ;;  %v2629_v22 = vld [vmem:[%s3676_s1 + $0x2c8] ss:$16 sps:$4 sm:$0xff]   ;;  %v2634_v23 = vld [vmem:[%s3676_s1 + $0x1ac] ss:$16 sps:$4 sm:$0xff]  }
  0x51   :  { %1548 = vmatprep.subr.bf16.mxu1 %v2550_v24  ;;  %v2637_v24 = vld [vmem:[%s3676_s1 + $0x2ac] ss:$16 sps:$4 sm:$0xff]  }
  0x53   :  { %1508 = vmatpush1.bf16.msra.mxu0 %v2545_v25  ;;  %v2632_v25 = vld [vmem:[%s3676_s1 + $0x1a8] ss:$16 sps:$4 sm:$0xff]  }
  0x54   :  { %1549 = vmatpush1.bf16.msra.mxu1 %v2548_v26  ;;  %1509 = vmatprep.subr.bf16.mxu0 %v2553_v27  ;;  %v2635_v26 = vld [vmem:[%s3676_s1 + $0x2a8] ss:$16 sps:$4 sm:$0xff]   ;;  %v2640_v27 = vld [vmem:[%s3676_s1 + $0x18c] ss:$16 sps:$4 sm:$0xff]  }
  0x55   :  { %1550 = vmatprep.subr.bf16.mxu1 %v2556_v28  ;;  %v2638_v28 = vld [vmem:[%s3676_s1 + $0x188] ss:$16 sps:$4 sm:$0xff]  }
  0x57   :  { %1510 = vmatpush1.bf16.msra.mxu0 %v2551_v29  ;;  %v2641_v29 = vld [vmem:[%s3676_s1 + $0x288] ss:$16 sps:$4 sm:$0xff]  }
  0x58   :  { %1551 = vmatpush1.bf16.msra.mxu1 %v2554_v30  ;;  %1511 = vmatprep.subr.bf16.mxu0 %v2559_v31  ;;  %v2646_v30 = vld [vmem:[%s3676_s1 + $0x16c] ss:$16 sps:$4 sm:$0xff]  }
  0x59   :  { %1552 = vmatprep.subr.bf16.mxu1 %v2562_v32  ;;  %v2649_v31 = vld [vmem:[%s3676_s1 + $0x26c] ss:$16 sps:$4 sm:$0xff]   ;;  %v2644_v32 = vld [vmem:[%s3676_s1 + $0x168] ss:$16 sps:$4 sm:$0xff]  }
  0x5b   :  { %1512 = vmatpush1.bf16.msra.mxu0 %v2557_v34  ;;  %v2652_v34 = vld [vmem:[%s3676_s1 + $0x14c] ss:$16 sps:$4 sm:$0xff]  }
  0x5c   :  { %1553 = vmatpush1.bf16.msra.mxu1 %v2560_v36  ;;  %1513 = vmatprep.subr.bf16.mxu0 %v2565_v37  ;;  %v2655_v36 = vld [vmem:[%s3676_s1 + $0x24c] ss:$16 sps:$4 sm:$0xff]   ;;  %v2650_v37 = vld [vmem:[%s3676_s1 + $0x148] ss:$16 sps:$4 sm:$0xff]  }
  0x5d   :  { %1554 = vmatprep.subr.bf16.mxu1 %v2568_v38  ;;  %v2653_v38 = vld [vmem:[%s3676_s1 + $0x248] ss:$16 sps:$4 sm:$0xff]  }
  0x5f   :  { %1514 = vmatpush1.bf16.msra.mxu0 %v2563_v39  ;;  %v2658_v39 = vld [vmem:[%s3676_s1 + $0x12c] ss:$16 sps:$4 sm:$0xff]  }
  0x60   :  { %1555 = vmatpush1.bf16.msra.mxu1 %v2566_v40  ;;  %1515 = vmatprep.subr.bf16.mxu0 %v2571_v41  ;;  %v2661_v40 = vld [vmem:[%s3676_s1 + $0x22c] ss:$16 sps:$4 sm:$0xff]   ;;  %v2656_v41 = vld [vmem:[%s3676_s1 + $0x128] ss:$16 sps:$4 sm:$0xff]  }
  0x61   :  { %1581 = vmatprep.subr.bf16.mxu1 %v2575_v42  ;;  %v2659_v42 = vld [vmem:[%s3676_s1 + $0x228] ss:$16 sps:$4 sm:$0xff]  }
  0x63   :  { %1573 = vmatmul.mubr.bf16.vlgmr.msra.gmra.mxu1 %v3179_v44  ;;  %1516 = vmatpush2.bf16.msra.mxu0 %v2569_v43  ;;  %v2664_v43 = vld [vmem:[%s3676_s1 + $0x10c] ss:$16 sps:$4 sm:$0xff]  }
  0x64   :  { %1582 = vmatpush1.bf16.msra.mxu1 %v2573_v45  ;;  %1517 = vmatprep.subr.bf16.mxu0 %v2578_v46  ;;  %v2667_v45 = vld [vmem:[%s3676_s1 + $0x20c] ss:$16 sps:$4 sm:$0xff]   ;;  %v2662_v46 = vld [vmem:[%s3676_s1 + $0x108] ss:$16 sps:$4 sm:$0xff]  }
  0x65   :  { %1583 = vmatprep.subr.bf16.mxu1 %v2581_v48  ;;  %1613 = vmatprep.mubr.bf16.mxu1 %v2991_v47  ;;  %v2593_v47 = vld [vmem:[%s3676_s1 + $0x8c] ss:$16 sps:$4 sm:$0xff]   ;;  %v2665_v48 = vld [vmem:[%s3676_s1 + $0x208] ss:$16 sps:$4 sm:$0xff]  }
  0x67   :  { %1518 = vmatpush2.bf16.msra.mxu0 %v2576_v49  ;;  %v2670_v49 = vld [vmem:[%s3676_s1 + $0x3ec] ss:$16 sps:$4 sm:$0xff]  }
  0x68   :  { %1584 = vmatpush1.bf16.msra.mxu1 %v2579_v50  ;;  %1519 = vmatprep.subr.bf16.mxu0 %v2584_v52  ;;  %v2673_v50 = vld [vmem:[%s3676_s1 + $0x4ec] ss:$16 sps:$4 sm:$0xff]   ;;  %v2668_v52 = vld [vmem:[%s3676_s1 + $0x3e8] ss:$16 sps:$4 sm:$0xff]  }
  0x69   :  { %1585 = vmatprep.subr.bf16.mxu1 %v2587_v53  ;;  %v2671_v53 = vld [vmem:[%s3676_s1 + $0x4e8] ss:$16 sps:$4 sm:$0xff]  }
  0x6b   :  { %1520 = vmatpush2.bf16.msra.mxu0 %v2582_v54  ;;  %v2676_v54 = vld [vmem:[%s3676_s1 + $0x3cc] ss:$16 sps:$4 sm:$0xff]  }
  0x6c   :  { %1586 = vmatpush1.bf16.msra.mxu1 %v2585_v55  ;;  %1521 = vmatprep.subr.bf16.mxu0 %v2590_v56  ;;  %v2679_v55 = vld [vmem:[%s3676_s1 + $0x4cc] ss:$16 sps:$4 sm:$0xff]   ;;  %v2674_v56 = vld [vmem:[%s3676_s1 + $0x3c8] ss:$16 sps:$4 sm:$0xff]  }
  0x6d   :  { %1587 = vmatprep.subr.bf16.mxu1 %v2593_v47  ;;  %v2677_v47 = vld [vmem:[%s3676_s1 + $0x4c8] ss:$16 sps:$4 sm:$0xff]  }
  0x6f   :  { %1522 = vmatpush2.bf16.msra.mxu0 %v2588_v57  ;;  %v2682_v57 = vld [vmem:[%s3676_s1 + $0x3ac] ss:$16 sps:$4 sm:$0xff]  }
  0x70   :  { %1588 = vmatpush1.bf16.msra.mxu1 %v2591_v58  ;;  %1523 = vmatprep.subr.bf16.mxu0 %v2596_v59  ;;  %v2685_v58 = vld [vmem:[%s3676_s1 + $0x4ac] ss:$16 sps:$4 sm:$0xff]   ;;  %v2680_v59 = vld [vmem:[%s3676_s1 + $0x3a8] ss:$16 sps:$4 sm:$0xff]  }
  0x71   :  { %1589 = vmatprep.subr.bf16.mxu1 %v2599_v60  ;;  %v2688_v60 = vld [vmem:[%s3676_s1 + $0x38c] ss:$16 sps:$4 sm:$0xff]  }
  0x73   :  { %1524 = vmatpush2.bf16.msra.mxu0 %v2594_v61  ;;  %v2691_v61 = vld [vmem:[%s3676_s1 + $0x48c] ss:$16 sps:$4 sm:$0xff]  }
  0x74   :  { %1590 = vmatpush1.bf16.msra.mxu1 %v2597_v62  ;;  %1525 = vmatprep.subr.bf16.mxu0 %v2602_v63  ;;  %v2686_v62 = vld [vmem:[%s3676_s1 + $0x388] ss:$16 sps:$4 sm:$0xff]   ;;  %v2694_v63 = vld [vmem:[%s3676_s1 + $0x36c] ss:$16 sps:$4 sm:$0xff]  }
  0x75   :  { %1591 = vmatprep.subr.bf16.mxu1 %v2605_v0  ;;  %v2697_v0 = vld [vmem:[%s3676_s1 + $0x46c] ss:$16 sps:$4 sm:$0xff]  }
  0x77   :  { %1526 = vmatpush2.bf16.msra.mxu0 %v2600_v1  ;;  %v2692_v1 = vld [vmem:[%s3676_s1 + $0x368] ss:$16 sps:$4 sm:$0xff]  }
  0x78   :  { %1592 = vmatpush1.bf16.msra.mxu1 %v2603_v2  ;;  %1527 = vmatprep.subr.bf16.mxu0 %v2608_v3  ;;  %v2695_v2 = vld [vmem:[%s3676_s1 + $0x468] ss:$16 sps:$4 sm:$0xff]  }
  0x79   :  { %1593 = vmatprep.subr.bf16.mxu1 %v2611_v4 }
  0x7b   :  { %1528 = vmatpush2.bf16.msra.mxu0 %v2606_v5 }
  0x7c   :  { %1594 = vmatpush1.bf16.msra.mxu1 %v2609_v8  ;;  %1529 = vmatprep.subr.bf16.mxu0 %v2614_v9 }
  0x7d   :  { %1595 = vmatprep.subr.bf16.mxu1 %v2617_v10 }
  0x7f   :  { %1530 = vmatpush2.bf16.msra.mxu0 %v2612_v11 }
  0x80   :  { %1596 = vmatpush1.bf16.msra.mxu1 %v2615_v12  ;;  %1622 = vmatprep.subr.bf16.mxu0 %v2625_v14 }
  0x81   :  { %1597 = vmatprep.subr.bf16.mxu1 %v2622_v13 }
  0x82   :  { %1532 = vmatmul.mubr.bf16.vlgmr.msra.gmra.mxu0 %v3278_v15 }
  0x83   :  { %1623 = vmatpush1.bf16.msra.mxu0 %v2623_v18  ;;  %1654 = vmatprep.mubr.bf16.mxu0 %v3002_v51  ;;  %v2643_v51 = vld [vmem:[%s3676_s1 + $0x28c] ss:$16 sps:$4 sm:$0xff]  }
  0x84   :  { %1598 = vmatpush2.bf16.msra.mxu1 %v2620_v17  ;;  %1624 = vmatprep.subr.bf16.mxu0 %v2631_v20 }
  0x85   :  { %1599 = vmatprep.subr.bf16.mxu1 %v2628_v19 }
  0x87   :  { %1625 = vmatpush1.bf16.msra.mxu0 %v2629_v22 }
  0x88   :  { %1600 = vmatpush2.bf16.msra.mxu1 %v2626_v21  ;;  %1626 = vmatprep.subr.bf16.mxu0 %v2637_v24 }
  0x89   :  { %1601 = vmatprep.subr.bf16.mxu1 %v2634_v23 }
  0x8b   :  { %1627 = vmatpush1.bf16.msra.mxu0 %v2635_v26 }
  0x8c   :  { %1602 = vmatpush2.bf16.msra.mxu1 %v2632_v25  ;;  %1628 = vmatprep.subr.bf16.mxu0 %v2643_v51 }
  0x8d   :  { %1603 = vmatprep.subr.bf16.mxu1 %v2640_v27 }
  0x8f   :  { %1629 = vmatpush1.bf16.msra.mxu0 %v2641_v29 }
  0x90   :  { %1604 = vmatpush2.bf16.msra.mxu1 %v2638_v28  ;;  %1630 = vmatprep.subr.bf16.mxu0 %v2649_v31 }
  0x91   :  { %1605 = vmatprep.subr.bf16.mxu1 %v2646_v30 }
  0x93   :  { %1631 = vmatpush1.bf16.msra.mxu0 %v2647_v33 }
  0x94   :  { %1606 = vmatpush2.bf16.msra.mxu1 %v2644_v32  ;;  %1632 = vmatprep.subr.bf16.mxu0 %v2655_v36 }
  0x95   :  { %1607 = vmatprep.subr.bf16.mxu1 %v2652_v34 }
  0x97   :  { %1633 = vmatpush1.bf16.msra.mxu0 %v2653_v38 }
  0x98   :  { %1608 = vmatpush2.bf16.msra.mxu1 %v2650_v37  ;;  %1634 = vmatprep.subr.bf16.mxu0 %v2661_v40 }
  0x99   :  { %1609 = vmatprep.subr.bf16.mxu1 %v2658_v39 }
  0x9b   :  { %1635 = vmatpush1.bf16.msra.mxu0 %v2659_v42 }
  0x9c   :  { %1610 = vmatpush2.bf16.msra.mxu1 %v2656_v41  ;;  %1636 = vmatprep.subr.bf16.mxu0 %v2667_v45 }
  0x9d   :  { %1611 = vmatprep.subr.bf16.mxu1 %v2664_v43 }
  0x9f   :  { %1637 = vmatpush1.bf16.msra.mxu0 %v2665_v48 }
  0xa0   :  { %1612 = vmatpush2.bf16.msra.mxu1 %v2662_v46  ;;  %1638 = vmatprep.subr.bf16.mxu0 %v2670_v49 }
  0xa1   :  { %1663 = vmatprep.subr.bf16.mxu1 %v2673_v50 }
  0xa3   :  { %1614 = vmatmul.mubr.bf16.vlgmr.msra.gmra.mxu1 %v3060_v6  ;;  %1639 = vmatpush2.bf16.msra.mxu0 %v2668_v52  ;;  %v2683_v6 = vld [vmem:[%s3676_s1 + $0x4a8] ss:$16 sps:$4 sm:$0xff]  }
  0xa4   :  { %1664 = vmatpush1.bf16.msra.mxu1 %v2671_v53  ;;  %1640 = vmatprep.subr.bf16.mxu0 %v2676_v54 }
  0xa5   :  { %1665 = vmatprep.subr.bf16.mxu1 %v2679_v55  ;;  %1695 = vmatprep.mubr.bf16.mxu1 %v3149_v35  ;;  %v2689_v35 = vld [vmem:[%s3676_s1 + $0x488] ss:$16 sps:$4 sm:$0xff]  }
  0xa7   :  { %1641 = vmatpush2.bf16.msra.mxu0 %v2674_v56 }
  0xa8   :  { %1666 = vmatpush1.bf16.msra.mxu1 %v2677_v47  ;;  %1642 = vmatprep.subr.bf16.mxu0 %v2682_v57 }
  0xa9   :  { %1667 = vmatprep.subr.bf16.mxu1 %v2685_v58 }
  0xab   :  { %1643 = vmatpush2.bf16.msra.mxu0 %v2680_v59 }
  0xac   :  { %1668 = vmatpush1.bf16.msra.mxu1 %v2683_v6  ;;  %1644 = vmatprep.subr.bf16.mxu0 %v2688_v60 }
  0xad   :  { %1669 = vmatprep.subr.bf16.mxu1 %v2691_v61 }
  0xaf   :  { %1645 = vmatpush2.bf16.msra.mxu0 %v2686_v62 }
  0xb0   :  { %1670 = vmatpush1.bf16.msra.mxu1 %v2689_v35 }
  0xb1   :  { %10 = vsyncpa [#allocation3], 0  ;;  %1646 = vmatprep.subr.bf16.mxu0 %v2694_v63  ;;  %1671 = vmatprep.subr.bf16.mxu1 %v2697_v0  ;;  %v2700_v3 = vld [vmem:[%s3676_s1 + $0x34c] ss:$16 sps:$4 sm:$0xff]   ;;  %v2698_v5 = vld [vmem:[%s3676_s1 + $0x348] ss:$16 sps:$4 sm:$0xff]  }
  0xb2   :  { %v2703_v4 = vld [vmem:[%s3676_s1 + $0x44c] ss:$16 sps:$4 sm:$0xff]   ;;  %v2701_v8 = vld [vmem:[%s3676_s1 + $0x448] ss:$16 sps:$4 sm:$0xff]   ;;  %v2766_v54 = vld [vmem:[%s3678_s3 + $0x70] sm:$0xff]   ;;  %s2819_s25 = smov [#allocation2]  }
  0xb3   :  { %1647 = vmatpush2.bf16.msra.mxu0 %v2692_v1  ;;  %v2706_v9 = vld [vmem:[%s3676_s1 + $0x32c] ss:$16 sps:$4 sm:$0xff]   ;;  %v2704_v11 = vld [vmem:[%s3676_s1 + $0x328] ss:$16 sps:$4 sm:$0xff]   ;;  %v2767_v55 = vld [vmem:[%s3678_s3 + $0x30] sm:$0xff]   ;;  %s2103_s26 = sshll.u32 %s2819_s25, 4  ;;  %s2104_s26 = int_to_ptr.vmem [resolvable:$true] %s2103_s26 }
  0xb4   :  { %1672 = vmatpush1.bf16.msra.mxu1 %v2695_v2  ;;  %1648 = vmatprep.subr.bf16.mxu0 %v2700_v3  ;;  %v2709_v10 = vld [vmem:[%s3676_s1 + $0x42c] ss:$16 sps:$4 sm:$0xff]   ;;  %v2707_v12 = vld [vmem:[%s3676_s1 + $0x428] ss:$16 sps:$4 sm:$0xff]   ;;  %v2774_v59 = vld [vmem:[%s3678_s3 + $0x50] sm:$0xff]   ;;  %s2796_s27 = scalar_lea.vmem %s2104_s26, 128  ;;  %p2801_p1 = scmp.lt.s32.totalorder %s2104_s26, %s2104_s26 }
  0xb5   :  { %1673 = vmatprep.subr.bf16.mxu1 %v2703_v4  ;;  %v2712_v13 = vld [vmem:[%s3676_s1 + $0x30c] ss:$16 sps:$4 sm:$0xff]   ;;  %v2710_v17 = vld [vmem:[%s3676_s1 + $0x308] ss:$16 sps:$4 sm:$0xff]   ;;  %v2775_v6 = vld [vmem:[%s3678_s3 + $0x10] sm:$0xff]   ;;  %p2797_p0 = scmp.ne.s32.totalorder %s2104_s26, %s2796_s27  ;;  %p2802_p2 = scmp.lt.s32.totalorder %s2796_s27, %s2796_s27 }
  0xb6   :  { %v2715_v14 = vld [vmem:[%s3676_s1 + $0x40c] ss:$16 sps:$4 sm:$0xff]   ;;  %v2713_v18 = vld [vmem:[%s3676_s1 + $0x408] ss:$16 sps:$4 sm:$0xff]   ;;  %v2778_v62 = vld [vmem:[%s3678_s3 + $0x40] sm:$0xff]  }
  0xb7   :  { %1649 = vmatpush2.bf16.msra.mxu0 %v2698_v5  ;;  %v2718_v19 = vld [vmem:[%s3676_s1 + $0x5ec] ss:$16 sps:$4 sm:$0xff]   ;;  %v2716_v21 = vld [vmem:[%s3676_s1 + $0x5e8] ss:$16 sps:$4 sm:$0xff]   ;;  %v2779_v35 = vld [vmem:[%s3678_s3] sm:$0xff]   ;;  %p2803_p3 = por %p2802_p2, %p2801_p1 }
  0xb8   :  { %1674 = vmatpush1.bf16.msra.mxu1 %v2701_v8  ;;  %1650 = vmatprep.subr.bf16.mxu0 %v2706_v9  ;;  %v2721_v20 = vld [vmem:[%s3676_s1 + $0x6ec] ss:$16 sps:$4 sm:$0xff]   ;;  %v2719_v22 = vld [vmem:[%s3676_s1 + $0x6e8] ss:$16 sps:$4 sm:$0xff]  }
  0xb9   :  { %1675 = vmatprep.subr.bf16.mxu1 %v2709_v10  ;;  %v2724_v23 = vld [vmem:[%s3676_s1 + $0x5cc] ss:$16 sps:$4 sm:$0xff]   ;;  %v2722_v25 = vld [vmem:[%s3676_s1 + $0x5c8] ss:$16 sps:$4 sm:$0xff]   ;;  %p2804_p4 = pnand %p2803_p3, %p2797_p0 }
  0xba   :  { %v2727_v24 = vld [vmem:[%s3676_s1 + $0x6cc] ss:$16 sps:$4 sm:$0xff]   ;;  %v2725_v26 = vld [vmem:[%s3676_s1 + $0x6c8] ss:$16 sps:$4 sm:$0xff]  }
  0xbb   :  { %1651 = vmatpush2.bf16.msra.mxu0 %v2704_v11  ;;  %v2730_v27 = vld [vmem:[%s3676_s1 + $0x5ac] ss:$16 sps:$4 sm:$0xff]   ;;  %v2728_v51 = vld [vmem:[%s3676_s1 + $0x5a8] ss:$16 sps:$4 sm:$0xff]   ;;  %v2782_v11 = vld [vmem:[%s3678_s3 + $0xf0] sm:$0xff]  }
  0xbc   :  { %1676 = vmatpush1.bf16.msra.mxu1 %v2707_v12  ;;  %1652 = vmatprep.subr.bf16.mxu0 %v2712_v13  ;;  %v2731_v28 = vld [vmem:[%s3676_s1 + $0x6a8] ss:$16 sps:$4 sm:$0xff]   ;;  %v2736_v29 = vld [vmem:[%s3676_s1 + $0x58c] ss:$16 sps:$4 sm:$0xff]   ;;  %v2783_v12 = vld [vmem:[%s3678_s3 + $0xb0] sm:$0xff]  }
  0xbd   :  { %1677 = vmatprep.subr.bf16.mxu1 %v2715_v14  ;;  %v2734_v30 = vld [vmem:[%s3676_s1 + $0x588] ss:$16 sps:$4 sm:$0xff]   ;;  %v2742_v32 = vld [vmem:[%s3676_s1 + $0x56c] ss:$16 sps:$4 sm:$0xff]  }
  0xbe   :  { %v2737_v31 = vld [vmem:[%s3676_s1 + $0x688] ss:$16 sps:$4 sm:$0xff]   ;;  %v2745_v33 = vld [vmem:[%s3676_s1 + $0x66c] ss:$16 sps:$4 sm:$0xff]  }
  0xbf   :  { %1653 = vmatpush2.bf16.msra.mxu0 %v2710_v17  ;;  %v2740_v34 = vld [vmem:[%s3676_s1 + $0x568] ss:$16 sps:$4 sm:$0xff]   ;;  %v2748_v37 = vld [vmem:[%s3676_s1 + $0x54c] ss:$16 sps:$4 sm:$0xff]   ;;  %v2786_v17 = vld [vmem:[%s3678_s3 + $0xe0] sm:$0xff]  }
  0xc0   :  { %1678 = vmatpush1.bf16.msra.mxu1 %v2713_v18  ;;  %1704 = vmatprep.subr.bf16.mxu0 %v2721_v20  ;;  %v2743_v36 = vld [vmem:[%s3676_s1 + $0x668] ss:$16 sps:$4 sm:$0xff]   ;;  %v2751_v38 = vld [vmem:[%s3676_s1 + $0x64c] ss:$16 sps:$4 sm:$0xff]   ;;  %v2787_v18 = vld [vmem:[%s3678_s3 + $0xa0] sm:$0xff]  }
  0xc1   :  { %1679 = vmatprep.subr.bf16.mxu1 %v2718_v19  ;;  %v2746_v39 = vld [vmem:[%s3676_s1 + $0x548] ss:$16 sps:$4 sm:$0xff]   ;;  %v2754_v41 = vld [vmem:[%s3676_s1 + $0x52c] ss:$16 sps:$4 sm:$0xff]  }
  0xc2   :  { %1655 = vmatmul.mubr.bf16.vlgmr.msra.gmra.mxu0 %v3062_v7  ;;  %v2733_v7 = vld [vmem:[%s3676_s1 + $0x6ac] ss:$16 sps:$4 sm:$0xff]   ;;  %v2749_v40 = vld [vmem:[%s3676_s1 + $0x648] ss:$16 sps:$4 sm:$0xff]  }
  0xc3   :  { %1705 = vmatpush1.bf16.msra.mxu0 %v2719_v22  ;;  %1736 = vmatprep.mubr.bf16.mxu0 %v2818_v16  ;;  %v2739_v16 = vld [vmem:[%s3676_s1 + $0x68c] ss:$16 sps:$4 sm:$0xff]   ;;  %v2752_v43 = vld [vmem:[%s3676_s1 + $0x528] ss:$16 sps:$4 sm:$0xff]   ;;  %v2791_v22 = vld [vmem:[%s3678_s3 + $0x90] sm:$0xff]  }
  0xc4   :  { %1680 = vmatpush2.bf16.msra.mxu1 %v2716_v21  ;;  %1706 = vmatprep.subr.bf16.mxu0 %v2727_v24  ;;  %v2757_v42 = vld [vmem:[%s3676_s1 + $0x62c] ss:$16 sps:$4 sm:$0xff]   ;;  %v2755_v45 = vld [vmem:[%s3676_s1 + $0x628] ss:$16 sps:$4 sm:$0xff]   ;;  %v2790_v21 = vld [vmem:[%s3678_s3 + $0xd0] sm:$0xff]  }
  0xc5   :  { %1681 = vmatprep.subr.bf16.mxu1 %v2724_v23  ;;  %v2760_v46 = vld [vmem:[%s3676_s1 + $0x50c] ss:$16 sps:$4 sm:$0xff]   ;;  %v2758_v49 = vld [vmem:[%s3676_s1 + $0x508] ss:$16 sps:$4 sm:$0xff]  }
  0xc6   :  { %v2763_v48 = vld [vmem:[%s3676_s1 + $0x60c] ss:$16 sps:$4 sm:$0xff]   ;;  %v2761_v50 = vld [vmem:[%s3676_s1 + $0x608] ss:$16 sps:$4 sm:$0xff]  }
  0xc7   :  { %1707 = vmatpush1.bf16.msra.mxu0 %v2725_v26  ;;  %v2764_v52 = vld [vmem:[%s3678_s3 + $0x78] sm:$0xff]   ;;  %v2768_v56 = vld [vmem:[%s3678_s3 + $0x68] sm:$0xff]  }
  0xc8   :  { %1682 = vmatpush2.bf16.msra.mxu1 %v2722_v25  ;;  %1708 = vmatprep.subr.bf16.mxu0 %v2733_v7  ;;  %v2765_v53 = vld [vmem:[%s3678_s3 + $0x38] sm:$0xff]   ;;  %v2769_v47 = vld [vmem:[%s3678_s3 + $0x28] sm:$0xff]  }
  0xc9   :  { %1683 = vmatprep.subr.bf16.mxu1 %v2730_v27  ;;  %v2772_v57 = vld [vmem:[%s3678_s3 + $0x58] sm:$0xff]   ;;  %v2776_v60 = vld [vmem:[%s3678_s3 + $0x48] sm:$0xff]  }
  0xca   :  { %v2773_v58 = vld [vmem:[%s3678_s3 + $0x18] sm:$0xff]   ;;  %v2777_v61 = vld [vmem:[%s3678_s3 + $0x8] sm:$0xff]  }
  0xcb   :  { %1709 = vmatpush1.bf16.msra.mxu0 %v2731_v28  ;;  %v2780_v9 = vld [vmem:[%s3678_s3 + $0xf8] sm:$0xff]   ;;  %v2784_v13 = vld [vmem:[%s3678_s3 + $0xe8] sm:$0xff]   ;;  %v2795_v28 = vld [vmem:[%s3678_s3 + $0x80] sm:$0xff]  }
  0xcc   :  { %1684 = vmatpush2.bf16.msra.mxu1 %v2728_v51  ;;  %1710 = vmatprep.subr.bf16.mxu0 %v2739_v16  ;;  %v2781_v10 = vld [vmem:[%s3678_s3 + $0xb8] sm:$0xff]   ;;  %v2785_v14 = vld [vmem:[%s3678_s3 + $0xa8] sm:$0xff]   ;;  %v2794_v51 = vld [vmem:[%s3678_s3 + $0xc0] sm:$0xff]  }
  0xcd   :  { %1685 = vmatprep.subr.bf16.mxu1 %v2736_v29  ;;  %v2788_v19 = vld [vmem:[%s3678_s3 + $0xd8] sm:$0xff]   ;;  %v2792_v25 = vld [vmem:[%s3678_s3 + $0xc8] sm:$0xff]   ;;  %v252_v29 = vlaneseq }
  0xce   :  { %v2789_v20 = vld [vmem:[%s3678_s3 + $0x98] sm:$0xff]   ;;  %v2793_v26 = vld [vmem:[%s3678_s3 + $0x88] sm:$0xff]  }
  0xcf   :  { %1711 = vmatpush1.bf16.msra.mxu0 %v2737_v31  ;;  %v253_v16 = vshrl.u32 %v252_v29, 7  ;;  %v250_v31 = vld [vmem:[%s3677_s2] sm:$0xf] }
  0xd0   :  { %1686 = vmatpush2.bf16.msra.mxu1 %v2734_v30  ;;  %1712 = vmatprep.subr.bf16.mxu0 %v2745_v33 }
  0xd1   :  { %1687 = vmatprep.subr.bf16.mxu1 %v2742_v32  ;;  %v254_v30 = vsub.s32 0, %v253_v16  ;;  %v258_v32 = vsub.s32 1, %v253_v16 }
  0xd3   :  { %1713 = vmatpush1.bf16.msra.mxu0 %v2743_v36  ;;  %v255_v33 = vrot.slane %v250_v31, %v254_v30 }
  0xd4   :  { %1688 = vmatpush2.bf16.msra.mxu1 %v2740_v34  ;;  %1714 = vmatprep.subr.bf16.mxu0 %v2751_v38  ;;  %v259_v34 = vrot.slane %v250_v31, %v258_v32 }
  0xd5   :  { %1689 = vmatprep.subr.bf16.mxu1 %v2748_v37 }
  0xd7   :  { %1715 = vmatpush1.bf16.msra.mxu0 %v2749_v40 }
  0xd8   :  { %1690 = vmatpush2.bf16.msra.mxu1 %v2746_v39  ;;  %1716 = vmatprep.subr.bf16.mxu0 %v2757_v42 }
  0xd9   :  { %1691 = vmatprep.subr.bf16.mxu1 %v2754_v41 }
  0xdb   :  { %1717 = vmatpush1.bf16.msra.mxu0 %v2755_v45 }
  0xdc   :  { %1692 = vmatpush2.bf16.msra.mxu1 %v2752_v43  ;;  %1718 = vmatprep.subr.bf16.mxu0 %v2763_v48 }
  0xdd   :  { %1693 = vmatprep.subr.bf16.mxu1 %v2760_v46 }
  0xdf   :  { %1719 = vmatpush1.bf16.msra.mxu0 %v2761_v50 }
  0xe0   :  { %1694 = vmatpush2.bf16.msra.mxu1 %v2758_v49  ;;  %2375 = vmatprep.subr.bf16.mxu0 %v2764_v52 }
  0xe1   :  { %2397 = vmatprep.subr.bf16.mxu1 %v2780_v9 }
  0xe2   :  { %1737 = vmatmul.mubr.bf16.vlgmr.msra.gmra.mxu0 %v3179_v44  ;;  %v2770_v44 = vld [vmem:[%s3678_s3 + $0x60] sm:$0xff]  }
  0xe3   :  { %1696 = vmatmul.mubr.bf16.vlgmr.msra.gmra.mxu1 %v3278_v15  ;;  %2376 = vmatpush3.bf16.msra.mxu0 %v2765_v53  ;;  %v2771_v15 = vld [vmem:[%s3678_s3 + $0x20] sm:$0xff]  }
  0xe4   :  { %2377 = vmatprep.subr.bf16.mxu0 %v2766_v54  ;;  %2398 = vmatpush3.bf16.msra.mxu1 %v2781_v10 }
  0xe5   :  { %2399 = vmatprep.subr.bf16.mxu1 %v2782_v11 }
  0xe7   :  { %2378 = vmatpush3.bf16.msra.mxu0 %v2767_v55 }
  0xe8   :  { %2379 = vmatprep.subr.bf16.mxu0 %v2768_v56  ;;  %2400 = vmatpush3.bf16.msra.mxu1 %v2783_v12 }
  0xe9   :  { %2401 = vmatprep.subr.bf16.mxu1 %v2784_v13 }
  0xeb   :  { %2380 = vmatpush3.bf16.msra.mxu0 %v2769_v47 }
  0xec   :  { %2381 = vmatprep.subr.bf16.mxu0 %v2770_v44  ;;  %2402 = vmatpush3.bf16.msra.mxu1 %v2785_v14 }
  0xed   :  { %2403 = vmatprep.subr.bf16.mxu1 %v2786_v17 }
  0xef   :  { %2382 = vmatpush3.bf16.msra.mxu0 %v2771_v15 }
  0xf0   :  { %2383 = vmatprep.subr.bf16.mxu0 %v2772_v57  ;;  %2404 = vmatpush3.bf16.msra.mxu1 %v2787_v18 }
  0xf1   :  { %2405 = vmatprep.subr.bf16.mxu1 %v2788_v19 }
  0xf3   :  { %2384 = vmatpush3.bf16.msra.mxu0 %v2773_v58 }
  0xf4   :  { %2385 = vmatprep.subr.bf16.mxu0 %v2774_v59  ;;  %2406 = vmatpush3.bf16.msra.mxu1 %v2789_v20 }
  0xf5   :  { %2407 = vmatprep.subr.bf16.mxu1 %v2790_v21 }
  0xf7   :  { %2386 = vmatpush3.bf16.msra.mxu0 %v2775_v6  ;;  %v262_v6 = vsub.s32 2, %v253_v16 }
  0xf8   :  { %2387 = vmatprep.subr.bf16.mxu0 %v2776_v60  ;;  %2408 = vmatpush3.bf16.msra.mxu1 %v2791_v22  ;;  %v266_v60 = vsub.s32 3, %v253_v16 }
  0xf9   :  { %2409 = vmatprep.subr.bf16.mxu1 %v2792_v25 }
  0xfb   :  { %2388 = vmatpush3.bf16.msra.mxu0 %v2777_v61  ;;  %v263_v61 = vrot.slane %v250_v31, %v262_v6 }
  0xfc   :  { %2389 = vmatprep.subr.bf16.mxu0 %v2778_v62  ;;  %2410 = vmatpush3.bf16.msra.mxu1 %v2793_v26  ;;  %v267_v62 = vrot.slane %v250_v31, %v266_v60 }
  0xfd   :  { %2411 = vmatprep.subr.bf16.mxu1 %v2794_v51 }
  0xff   :  { %2390 = vmatpush3.bf16.msra.mxu0 %v2779_v35 }
 0x100   :  { %2412 = vmatpush3.bf16.msra.mxu1 %v2795_v28 }
 0x102   :  { %v1451_v63 = vpop.f32.mrf.mxu0 }
 0x103   :  { %v1492_v0 = vpop.f32.mrf.mxu1  ;;  %v1452_v36 = vadd.f32 %v1451_v63, %v255_v33 }
 0x104   :  { %v1453_v1 = vpop.f32.mrf.mxu0 }
 0x105   :  { %v1494_v2 = vpop.f32.mrf.mxu1  ;;  %v1454_v37 = vadd.f32 %v1453_v1, %v259_v34  ;;  %v1493_v38 = vadd.f32 %v1492_v0, %v1452_v36 }
 0x106   :  { %v1455_v3 = vpop.f32.mrf.mxu0 }
 0x107   :  { %v1496_v4 = vpop.f32.mrf.mxu1  ;;  %v1495_v40 = vadd.f32 %v1494_v2, %v1454_v37 }
 0x108   :  { %v1456_v5 = vpop.f32.mrf.mxu0 }
 0x109   :  { %v1497_v8 = vpop.f32.mrf.mxu1 }
 0x123   :  { %v1574_v23 = vpop.f32.mrf.mxu1 }
 0x125   :  { %v1576_v24 = vpop.f32.mrf.mxu1 }
 0x127   :  { %v1578_v27 = vpop.f32.mrf.mxu1 }
 0x128   :  { %v2342_v27 = vld [vmem:[%s3679_s4] ss:$0 sm:$0xff] }
 0x129   :  { %v1579_v7 = vpop.f32.mrf.mxu1 }
 0x142   :  { %v1533_v39 = vpop.f32.mrf.mxu0 }
 0x143   :  { %v1534_v41 = vadd.f32 %v1533_v39, %v1493_v38 }
 0x144   :  { %v1535_v42 = vpop.f32.mrf.mxu0 }
 0x145   :  { %v1575_v43 = vadd.f32 %v1574_v23, %v1534_v41  ;;  %v1536_v45 = vadd.f32 %v1535_v42, %v1495_v40 }
 0x146   :  { %v1537_v46 = vpop.f32.mrf.mxu0 }
 0x147   :  { %v1577_v48 = vadd.f32 %v1576_v24, %v1536_v45  ;;  %v1745_v49 = vmax.f32 %v1575_v43, 0.0 }
 0x148   :  { %v1538_v50 = vpop.f32.mrf.mxu0 }
 0x149   :  { %v1746_v52 = vmax.f32 %v1577_v48, 0.0  ;;  %v1749_v54 = vpack.c.bf16 %v1745_v49, %v1745_v49 }
 0x14b   :  { %v1750_v53 = vpack.c.bf16 %v1746_v52, %v1746_v52 }
 0x14d   :  { %2048 = vmatprep.mubr.bf16.mxu0 %v1750_v53 }
 0x14e   :  { %2049 = vmatmul.mubr.bf16.vlgmr.msra.gmra.mxu0 %v1749_v54 }
 0x163   :  { %v1615_v55 = vpop.f32.mrf.mxu1 }
 0x164   :  { %v1616_v35 = vadd.f32 %v1615_v55, %v263_v61 }
 0x165   :  { %v1617_v56 = vpop.f32.mrf.mxu1 }
 0x166   :  { %v1618_v63 = vadd.f32 %v1617_v56, %v267_v62 }
 0x167   :  { %v1619_v47 = vpop.f32.mrf.mxu1 }
 0x169   :  { %v1620_v44 = vpop.f32.mrf.mxu1 }
 0x182   :  { %v1656_v15 = vpop.f32.mrf.mxu0 }
 0x183   :  { %v1657_v0 = vadd.f32 %v1656_v15, %v1616_v35 }
 0x184   :  { %v1658_v57 = vpop.f32.mrf.mxu0 }
 0x185   :  { %v1659_v3 = vadd.f32 %v1658_v57, %v1618_v63 }
 0x186   :  { %v1660_v58 = vpop.f32.mrf.mxu0 }
 0x188   :  { %v1661_v59 = vpop.f32.mrf.mxu0 }
 0x1a2   :  { %v1738_v2 = vpop.f32.mrf.mxu0 }
 0x1a3   :  { %v1697_v1 = vpop.f32.mrf.mxu1 }
 0x1a4   :  { %v1698_v4 = vadd.f32 %v1697_v1, %v1657_v0  ;;  %v1740_v8 = vpop.f32.mrf.mxu0 }
 0x1a5   :  { %v1699_v5 = vpop.f32.mrf.mxu1 }
 0x1a6   :  { %v1739_v9 = vadd.f32 %v1738_v2, %v1698_v4  ;;  %v1700_v10 = vadd.f32 %v1699_v5, %v1659_v3  ;;  %v1742_v12 = vpop.f32.mrf.mxu0 }
 0x1a7   :  { %v1701_v11 = vpop.f32.mrf.mxu1 }
 0x1a8   :  { %v1741_v13 = vadd.f32 %v1740_v8, %v1700_v10  ;;  %v1747_v14 = vmax.f32 %v1739_v9, 0.0  ;;  %v1743_v18 = vpop.f32.mrf.mxu0 }
 0x1a9   :  { %v1702_v17 = vpop.f32.mrf.mxu1 }
 0x1aa   :  { %v1748_v19 = vmax.f32 %v1741_v13, 0.0  ;;  %v1751_v21 = vpack.c.bf16 %v1747_v14, %v1747_v14 }
 0x1ac   :  { %v1752_v20 = vpack.c.bf16 %v1748_v19, %v1748_v19 }
 0x1ae   :  { %2088 = vmatprep.mubr.bf16.mxu1 %v1752_v20 }
 0x1af   :  { %2089 = vmatmul.mubr.bf16.vlgmr.msra.gmra.mxu1 %v1751_v21 }
 0x20e   :  { %v2391_v22 = vpop.f32.mrf.mxu0 }
 0x210   :  { %v2392_v23 = vpop.f32.mrf.mxu0 }
 0x211   :  { %v2393_v24 = vadd.f32 %v2392_v23, %v2391_v22 }
 0x212   :  { %v2394_v25 = vpop.f32.mrf.mxu0 }
 0x213   :  { %v2051_v28 = vadd.f32 %v2393_v24, %v2342_v27 }
 0x214   :  { %v2395_v26 = vpop.f32.mrf.mxu0 }
 0x26f   :  { %v2413_v7 = vpop.f32.mrf.mxu1 }
 0x271   :  { %v2414_v51 = vpop.f32.mrf.mxu1 }
 0x272   :  { %v2415_v29 = vadd.f32 %v2414_v51, %v2413_v7 }
 0x273   :  { %v2416_v16 = vpop.f32.mrf.mxu1 }
 0x274   :  { %v2091_v30 = vadd.f32 %v2415_v29, %v2051_v28 }
 0x275   :  { %v2417_v31 = vpop.f32.mrf.mxu1 }
 0x276   :  { %2096 = vst [vmem:[#allocation2] sm:$0xff] %v2091_v30 }
 0x277   :  { %2807 = shalt.err (!%p2804_p4)
}
 0x278   :  { %2106 = dma.vmem_to_hbm [thread:$0]  %s2104_s26, 128, %s3680_s5, [#allocation3]  }
 0x279   :  { %2816 = dma.done.wait [#allocation3], 128  }
 0x27a   :  { %2817 = vsyncadd [#allocation3], 4294967168 }
 0x27b   :  { %2110 = vsyncpa [#allocation3], 1 }

</bundles_post_ra>
